<compile_context>
chip_gen: v7x
topology: tpu7x:2x2x1
jax: 0.10.0
libtpu: 0.0.40
codegen_flags: <defaults>
</compile_context>

<pallas_src>
import math

import jax
import jax.numpy as jnp
from jax import lax
from jax.experimental import pallas as pl
from jax.experimental.pallas import tpu as pltpu


HALO = 8  # sublane-aligned halo >= max dilation (4); keeps the central slice aligned
_VMEM_LIMIT = 48 * 1024 * 1024  # raise v5e's 16 MiB scoped default, stay under v7x's 64 MiB


# ----------------------------------------------------------------------------
# Fused ConvBlock kernel (3 dilated residual layers [+ down conv] [+ shortcut conv])
# ----------------------------------------------------------------------------
def fused_conv_block(inputs, layers, *, in_scale=1.0, down=None, st=None):
    """One ConvBlock as a single Pallas kernel.

    inputs  : list of (B, T, C) f32 arrays; summed and scaled by `in_scale` in-kernel.
    layers  : 3 tuples (w_bf16 (3C, C) [tap-major rows], b_f32 (1, C), alpha float).
    down    : optional (w_bf16 (r*C, 2C), b_f32 (1, 2C), alpha, r): PReLU + strided conv.
    st      : optional (w_bf16 (rate*C, oc), b_f32 (1, oc), alpha, rate): shortcut conv
              on the pre-downsample features.
    Returns main output (downsampled if `down` else residual features) [, shortcut output].
    """
    B, T, C = inputs[0].shape
    n_in = len(inputs)
    scale = float(in_scale)
    alphas = tuple(float(l[2]) for l in layers)
    im2col = C < 128  # fold taps into matmul K when channels underfill the MXU lanes

    operands = list(inputs)
    for (w, b, _a) in layers:
        operands += [w, b]

    if down is not None:
        wd, bd, a_down, r_down = down
        a_down, r_down = float(a_down), int(r_down)
        To, Cd = T // r_down, wd.shape[1]
        operands += [wd, bd]
    if st is not None:
        wst, bst, a_st, r_st = st
        a_st, r_st = float(a_st), int(r_st)
        Ts, Cs = T // r_st, wst.shape[1]
        operands += [wst, bst]

    out_shape, out_specs = [], []
    if down is not None:
        out_shape.append(jax.ShapeDtypeStruct((B, To, Cd), jnp.float32))
        out_specs.append(pl.BlockSpec((1, To, Cd), lambda b: (b, 0, 0)))
    else:
        out_shape.append(jax.ShapeDtypeStruct((B, T, C), jnp.float32))
        out_specs.append(pl.BlockSpec((1, T, C), lambda b: (b, 0, 0)))
    if st is not None:
        out_shape.append(jax.ShapeDtypeStruct((B, Ts, Cs), jnp.float32))
        out_specs.append(pl.BlockSpec((1, Ts, Cs), lambda b: (b, 0, 0)))

    in_specs = [pl.BlockSpec((1, T, C), lambda b: (b, 0, 0)) for _ in range(n_in)]
    for op in operands[n_in:]:  # grid-invariant weights / biases
        in_specs.append(pl.BlockSpec(op.shape, lambda b, nd=op.ndim: (0,) * nd))

    def kernel(*refs):
        in_refs = refs[:n_in]
        pos = n_in
        lyr = []
        for _ in range(3):
            lyr.append((refs[pos], refs[pos + 1]))
            pos += 2
        if down is not None:
            wd_ref, bd_ref = refs[pos], refs[pos + 1]
            pos += 2
        if st is not None:
            wst_ref, bst_ref = refs[pos], refs[pos + 1]
            pos += 2
        o_main = refs[pos]
        pos += 1
        if st is not None:
            o_st = refs[pos]
            pos += 1
        buf = refs[pos]  # (HALO + T + HALO, C) f32 VMEM scratch

        # zero only the halo rows; the center is fully overwritten below.  Done every grid
        # step (2*HALO rows only) so megacore sharding of the batch grid stays correct.
        zhalo = jnp.zeros((HALO, C), jnp.float32)
        buf[pl.ds(0, HALO), :] = zhalo
        buf[pl.ds(T + HALO, HALO), :] = zhalo

        # fused input sum (+ scale), e.g. (x_mel + sum(encoder outputs)) * norm_factor
        x = in_refs[0][0]
        for other in in_refs[1:]:
            x = x + other[0]
        if scale != 1.0:
            x = x * scale
        buf[pl.ds(HALO, T), :] = x

        # three residual dilated PReLU->conv3 layers; residual re-read from buf each layer
        for li, d in enumerate((1, 2, 4)):
            w_ref, b_ref = lyr[li]
            ap = buf[...]
            ap = jnp.where(ap >= 0.0, ap, alphas[li] * ap).astype(jnp.bfloat16)
            if im2col:  # one K=3C matmul
                cols = jnp.concatenate(
                    [ap[HALO - d:HALO - d + T, :],
                     ap[HALO:HALO + T, :],
                     ap[HALO + d:HALO + d + T, :]], axis=1)           # (T, 3C)
                acc = jnp.dot(cols, w_ref[...], preferred_element_type=jnp.float32)
            else:       # wide channels: keep separate taps (no lane relayout)
                wk = w_ref[...]                                        # (3C, C)
                acc = jnp.dot(ap[HALO - d:HALO - d + T, :], wk[0:C],
                              preferred_element_type=jnp.float32)
                acc = acc + jnp.dot(ap[HALO:HALO + T, :], wk[C:2 * C],
                                    preferred_element_type=jnp.float32)
                acc = acc + jnp.dot(ap[HALO + d:HALO + d + T, :], wk[2 * C:3 * C],
                                    preferred_element_type=jnp.float32)
            buf[pl.ds(HALO, T), :] = buf[pl.ds(HALO, T), :] + acc + b_ref[...]

        if down is None and st is None:
            o_main[0] = buf[pl.ds(HALO, T), :]

        def strided_conv(w_ref_, b_ref_, alpha_, r_, To_, Cout_, o_ref_):
            # PReLU -> Conv1d(kernel=stride=r): kernel==stride so windows are contiguous
            if im2col:  # single K=r*C matmul
                cols = jnp.concatenate(
                    [buf[pl.ds(HALO + k, To_, stride=r_), :] for k in range(r_)], axis=1)
                cols = jnp.where(cols >= 0.0, cols, alpha_ * cols).astype(jnp.bfloat16)
                o_ref_[0] = jnp.dot(cols, w_ref_[...],
                                    preferred_element_type=jnp.float32) + b_ref_[...]
            else:
                wk = w_ref_[...]
                acc = jnp.zeros((To_, Cout_), jnp.float32)
                for k in range(r_):
                    ak = buf[pl.ds(HALO + k, To_, stride=r_), :]
                    ak = jnp.where(ak >= 0.0, ak, alpha_ * ak).astype(jnp.bfloat16)
                    acc = acc + jnp.dot(ak, wk[k * C:(k + 1) * C],
                                        preferred_element_type=jnp.float32)
                o_ref_[0] = acc + b_ref_[...]

        if down is not None:   # PReLU -> Conv1d(kernel=stride=r), channels x2
            strided_conv(wd_ref, bd_ref, a_down, r_down, To, Cd, o_main)
        if st is not None:     # shortcut PReLU -> Conv1d(kernel=stride=rate)
            strided_conv(wst_ref, bst_ref, a_st, r_st, Ts, Cs, o_st)

    return pl.pallas_call(
        kernel,
        out_shape=tuple(out_shape) if len(out_shape) > 1 else out_shape[0],
        grid=(B,),
        in_specs=in_specs,
        out_specs=tuple(out_specs) if len(out_specs) > 1 else out_specs[0],
        scratch_shapes=[pltpu.VMEM((T + 2 * HALO, C), jnp.float32)],
        compiler_params=pltpu.CompilerParams(
            dimension_semantics=("parallel",),
            vmem_limit_bytes=_VMEM_LIMIT),
    )(*operands)


# ----------------------------------------------------------------------------
# Fused bidirectional GRU layer kernel (torch semantics), batched recurrence
# ----------------------------------------------------------------------------
def gru_bidir_layer(x, layer, *, max_batch_block=8):
    """One bidirectional GRU layer as a single Pallas kernel.

    x     : (B, T, I) f32.
    layer : dict with
            w_i   (I, 6H)  bf16  [W_ih^fwd | W_ih^bwd]^T  (pre-concatenated)
            b_i   (1, 6H)  f32   b_ih + [b_hr, b_hz, 0] per direction (pre-folded)
            wh_f, wh_b (H, 3H) bf16,  bhn_f, bhn_b (1, H) f32.
    Returns (B, T, 2H): [..., :H] forward states, [..., H:] backward states.
    """
    B, T, I = x.shape
    H = layer["wh_f"].shape[0]
    Bb = B if B <= max_batch_block else max_batch_block   # batch rows per grid step
    num_blocks = -(-B // Bb)
    unroll = next(u for u in (8, 4, 2, 1) if T % u == 0)

    operands = [x, layer["w_i"], layer["wh_f"], layer["wh_b"],
                layer["b_i"], layer["bhn_f"], layer["bhn_b"]]
    in_specs = [pl.BlockSpec((Bb, T, I), lambda i: (i, 0, 0))]
    for op in operands[1:]:
        in_specs.append(pl.BlockSpec(op.shape, lambda i, nd=op.ndim: (0,) * nd))

    def kernel(x_ref, wi_ref, whf_ref, whb_ref, bi_ref, bhnf_ref, bhnb_ref,
               o_ref, gi_sc, out_sc):
        # fused both-direction input projection, stored time-major in VMEM so the
        # recurrence reads dense (Bb, 3H) rows per step.
        wi = wi_ref[...]
        bi = bi_ref[...]
        for b in range(Bb):
            gi_sc[:, b, :] = jnp.dot(x_ref[b].astype(jnp.bfloat16), wi,
                                     preferred_element_type=jnp.float32) + bi

        whf = whf_ref[...]      # (H, 3H) bf16
        whb = whb_ref[...]
        bhn_f = bhnf_ref[...]   # (1, H) f32
        bhn_b = bhnb_ref[...]

        def cell(gi_t, gh, b_hn, h_prev):
            r = jax.nn.sigmoid(gi_t[:, 0:H] + gh[:, 0:H])
            z = jax.nn.sigmoid(gi_t[:, H:2 * H] + gh[:, H:2 * H])
            n = jnp.tanh(gi_t[:, 2 * H:3 * H] + r * (gh[:, 2 * H:3 * H] + b_hn))
            return (1.0 - z) * n + z * h_prev

        def step(t, carry):
            hf, hb = carry                     # (Bb, H) f32 each
            tb = T - 1 - t                     # backward direction, in-kernel reversal
            gif = gi_sc[pl.ds(t, 1), :, 0:3 * H][0]          # (Bb, 3H)
            gib = gi_sc[pl.ds(tb, 1), :, 3 * H:6 * H][0]     # (Bb, 3H)
            ghf = jnp.dot(hf.astype(jnp.bfloat16), whf, preferred_element_type=jnp.float32)
            ghb = jnp.dot(hb.astype(jnp.bfloat16), whb, preferred_element_type=jnp.float32)
            hf = cell(gif, ghf, bhn_f, hf)
            hb = cell(gib, ghb, bhn_b, hb)
            out_sc[pl.ds(t, 1), :, 0:H] = hf.reshape(1, Bb, H)
            out_sc[pl.ds(tb, 1), :, H:2 * H] = hb.reshape(1, Bb, H)
            return hf, hb

        h0 = jnp.zeros((Bb, H), jnp.float32)
        lax.fori_loop(0, T, step, (h0, h0), unroll=unroll)

        # place results into the (Bb, T, 2H) output block
        for b in range(Bb):
            o_ref[b] = out_sc[:, b, :]

    return pl.pallas_call(
        kernel,
        out_shape=jax.ShapeDtypeStruct((B, T, 2 * H), jnp.float32),
        grid=(num_blocks,),
        in_specs=in_specs,
        out_specs=pl.BlockSpec((Bb, T, 2 * H), lambda i: (i, 0, 0)),
        scratch_shapes=[pltpu.VMEM((T, Bb, 6 * H), jnp.float32),
                        pltpu.VMEM((T, Bb, 2 * H), jnp.float32)],
        compiler_params=pltpu.CompilerParams(
            dimension_semantics=("parallel",),
            vmem_limit_bytes=_VMEM_LIMIT),
    )(*operands)


# ----------------------------------------------------------------------------
# Module assembly (glue)
# ----------------------------------------------------------------------------
def st_rates(ds_factors):
    rates = [ds_factors[-1]]
    for r in ds_factors[-2::-1]:
        rates.append(rates[-1] * r)
    return rates[::-1]


def conditioner_encoder(x, x_mel, params, ds_factors, with_gru_residual=False):
    """x: (B, T0, c); x_mel: (B, T0/prod(ds_factors), c*2**L).  Returns (out, lengths[::-1])."""
    L = len(ds_factors)
    shortcuts = []
    lengths = []
    for i in range(L):
        lengths.append(x.shape[1])
        blk = params[f"ds{i}"]
        st = params.get(f"st{i}")  # st_convs[L-1] is None
        if st is not None:
            x, sc = fused_conv_block([x], blk["layers"], down=blk["down"], st=st)
            shortcuts.append(sc)
        else:
            x = fused_conv_block([x], blk["layers"], down=blk["down"])

    norm_factor = 1.0 / math.sqrt(len(shortcuts) + 1 + 1)
    # (x_mel + sum(shortcuts) + x) * norm_factor is fused into conv_block1
    out = fused_conv_block([x_mel] + shortcuts + [x], params["cb1"]["layers"],
                           in_scale=norm_factor)
    if with_gru_residual:
        res = out
    for layer in params["gru"]:
        out = gru_bidir_layer(out, layer)
    if with_gru_residual:
        out = (out + res) / math.sqrt(2.0)
    out = fused_conv_block([out], params["cb2"]["layers"])
    return out, lengths[::-1]


# ----------------------------------------------------------------------------
# Deterministic parameter init (torch-layout) + one-time kernel-layout preparation
# ----------------------------------------------------------------------------
def _init_conv_block(key, channels, r=None):
    p = {}
    for i in range(3):
        key, kw, kb = jax.random.split(key, 3)
        p[f"conv{i}_w"] = 0.1 * jax.random.normal(kw, (channels, channels, 3), jnp.float32)
        p[f"conv{i}_b"] = 0.01 * jax.random.normal(kb, (channels,), jnp.float32)
        p[f"conv{i}_alpha"] = 0.25
    if r is not None:
        key, kw, kb = jax.random.split(key, 3)
        p["down_w"] = 0.1 * jax.random.normal(kw, (2 * channels, channels, r), jnp.float32)
        p["down_b"] = 0.01 * jax.random.normal(kb, (2 * channels,), jnp.float32)
        p["down_alpha"] = 0.25
    return p, key


def init_params(key, ds_factors, c):
    L = len(ds_factors)
    oc = c * 2 ** L
    rates = st_rates(ds_factors)
    params = {}
    for i, r in enumerate(ds_factors):
        params[f"ds{i}"], key = _init_conv_block(key, c * 2 ** i, r=r)
    for i in range(L - 1):  # num_layers = L - 1 strided shortcut convs
        key, kw, kb = jax.random.split(key, 3)
        params[f"st{i}"] = dict(
            w=0.1 * jax.random.normal(kw, (oc, c * 2 ** i, rates[i]), jnp.float32),
            b=0.01 * jax.random.normal(kb, (oc,), jnp.float32),
            alpha=0.25,
        )
    params["cb1"], key = _init_conv_block(key, oc)
    params["cb2"], key = _init_conv_block(key, oc)
    hidden = oc // 2
    gru = []
    for layer in range(2):
        isz = oc if layer == 0 else 2 * hidden
        layer_p = {}
        for direction in ("fwd", "bwd"):
            key, k1, k2, k3, k4 = jax.random.split(key, 5)
            layer_p[direction] = dict(
                w_ih=0.1 * jax.random.normal(k1, (3 * hidden, isz), jnp.float32),
                w_hh=0.1 * jax.random.normal(k2, (3 * hidden, hidden), jnp.float32),
                b_ih=0.01 * jax.random.normal(k3, (3 * hidden,), jnp.float32),
                b_hh=0.01 * jax.random.normal(k4, (3 * hidden,), jnp.float32),
            )
        gru.append(layer_p)
    params["gru"] = gru
    return params


def prepare_params(raw, ds_factors):
    """One-time conversion into kernel-ready layout: tap-major packed bf16 matmul weights,
    reshaped f32 biases, fused/folded GRU gate weights and biases, python-float alphas."""
    L = len(ds_factors)
    rates = st_rates(ds_factors)

    def pack_conv(w, b):
        # torch Conv1d weight (Cout, Cin, k) -> (k*Cin, Cout) bf16, tap-major rows
        k, cin, cout = w.shape[2], w.shape[1], w.shape[0]
        wt = jnp.transpose(w, (2, 1, 0)).reshape(k * cin, cout)
        return wt.astype(jnp.bfloat16), b.reshape(1, -1).astype(jnp.float32)

    def conv_layers(p):
        layers = []
        for i in range(3):
            w, b = pack_conv(p[f"conv{i}_w"], p[f"conv{i}_b"])
            layers.append((w, b, float(p[f"conv{i}_alpha"])))
        return layers

    prep = {}
    for i, r in enumerate(ds_factors):
        p = raw[f"ds{i}"]
        wd, bd = pack_conv(p["down_w"], p["down_b"])
        prep[f"ds{i}"] = {"layers": conv_layers(p),
                          "down": (wd, bd, float(p["down_alpha"]), int(r))}
    for i in range(L - 1):
        p = raw[f"st{i}"]
        w, b = pack_conv(p["w"], p["b"])
        prep[f"st{i}"] = (w, b, float(p["alpha"]), int(rates[i]))
    prep["cb1"] = {"layers": conv_layers(raw["cb1"])}
    prep["cb2"] = {"layers": conv_layers(raw["cb2"])}

    gru = []
    for lp in raw["gru"]:
        H = lp["fwd"]["w_hh"].shape[1]

        def prep_dir(g):
            b_gi = g["b_ih"] + jnp.concatenate(
                [g["b_hh"][:2 * H], jnp.zeros((H,), jnp.float32)])
            return (jnp.transpose(g["w_ih"]).astype(jnp.bfloat16),        # (I, 3H)
                    jnp.transpose(g["w_hh"]).astype(jnp.bfloat16),        # (H, 3H)
                    b_gi.reshape(1, -1).astype(jnp.float32),              # (1, 3H)
                    g["b_hh"][2 * H:].reshape(1, -1).astype(jnp.float32)) # (1, H)

        wif, whf, bgf, bhnf = prep_dir(lp["fwd"])
        wib, whb, bgb, bhnb = prep_dir(lp["bwd"])
        gru.append(dict(
            w_i=jnp.concatenate([wif, wib], axis=1),   # (I, 6H) fused direction proj
            b_i=jnp.concatenate([bgf, bgb], axis=1),   # (1, 6H)
            wh_f=whf, wh_b=whb, bhn_f=bhnf, bhn_b=bhnb))
    prep["gru"] = gru
    return prep


# ----------------------------------------------------------------------------
if __name__ == "__main__":
    ds_factors = [2, 2]
    c = 4                               # input_channels
    B, T0 = 2, 16
    L = len(ds_factors)
    oc = c * 2 ** L                     # 16
    Tf = T0 // math.prod(ds_factors)    # 4

    key = jax.random.PRNGKey(0)
    kx, kmel, kp = jax.random.split(key, 3)
    # PyTorch shapes: x (B, c, T0) = (2, 4, 16); x_mel (B, oc, Tf) = (2, 16, 4).
    # Channels-last layout used here:
    x = jax.random.normal(kx, (B, T0, c), jnp.float32)
    x_mel = jax.random.normal(kmel, (B, Tf, oc), jnp.float32)

    raw_params = init_params(kp, ds_factors, c)
    params = prepare_params(raw_params, ds_factors)

    out, lengths = conditioner_encoder(x, x_mel, params, ds_factors)
    out = jax.block_until_ready(out)

    assert out.shape == (B, Tf, oc), out.shape
    assert lengths == [T0 // ds_factors[0], T0], lengths
    assert bool(jnp.all(jnp.isfinite(out)))
    print("KERNEL_OK")
</pallas_src>

<mosaic_0001>
module attributes {stable_mosaic.version = 11 : i64} {
  func.func @kernel(%arg0: i32, %arg1: memref<1x16x4xf32, #tpu.memory_space<vmem>>, %arg2: memref<12x4xbf16, #tpu.memory_space<vmem>>, %arg3: memref<1x4xf32, #tpu.memory_space<vmem>>, %arg4: memref<12x4xbf16, #tpu.memory_space<vmem>>, %arg5: memref<1x4xf32, #tpu.memory_space<vmem>>, %arg6: memref<12x4xbf16, #tpu.memory_space<vmem>>, %arg7: memref<1x4xf32, #tpu.memory_space<vmem>>, %arg8: memref<8x8xbf16, #tpu.memory_space<vmem>>, %arg9: memref<1x8xf32, #tpu.memory_space<vmem>>, %arg10: memref<16x16xbf16, #tpu.memory_space<vmem>>, %arg11: memref<1x16xf32, #tpu.memory_space<vmem>>, %arg12: memref<1x8x8xf32, #tpu.memory_space<vmem>>, %arg13: memref<1x4x16xf32, #tpu.memory_space<vmem>>, %arg14: memref<32x4xf32, #tpu.memory_space<vmem>>) attributes {dimension_semantics = [#tpu.dimension_semantics<parallel>], iteration_bounds = array<i64: 2>, scalar_prefetch = 0 : i64, scratch_operands = 1 : i64, tpu.core_type = #tpu.core_type<tc>, window_params = [{transform_indices = @transform_0, window_bounds = array<i64: 1, 16, 4>}, {pipeline_mode = #tpu.pipeline_mode<synchronous>, transform_indices = @transform_1, window_bounds = array<i64: 12, 4>}, {pipeline_mode = #tpu.pipeline_mode<synchronous>, transform_indices = @transform_2, window_bounds = array<i64: 1, 4>}, {pipeline_mode = #tpu.pipeline_mode<synchronous>, transform_indices = @transform_3, window_bounds = array<i64: 12, 4>}, {pipeline_mode = #tpu.pipeline_mode<synchronous>, transform_indices = @transform_4, window_bounds = array<i64: 1, 4>}, {pipeline_mode = #tpu.pipeline_mode<synchronous>, transform_indices = @transform_5, window_bounds = array<i64: 12, 4>}, {pipeline_mode = #tpu.pipeline_mode<synchronous>, transform_indices = @transform_6, window_bounds = array<i64: 1, 4>}, {pipeline_mode = #tpu.pipeline_mode<synchronous>, transform_indices = @transform_7, window_bounds = array<i64: 8, 8>}, {pipeline_mode = #tpu.pipeline_mode<synchronous>, transform_indices = @transform_8, window_bounds = array<i64: 1, 8>}, {pipeline_mode = #tpu.pipeline_mode<synchronous>, transform_indices = @transform_9, window_bounds = array<i64: 16, 16>}, {pipeline_mode = #tpu.pipeline_mode<synchronous>, transform_indices = @transform_10, window_bounds = array<i64: 1, 16>}, {transform_indices = @transform_11, window_bounds = array<i64: 1, 8, 8>}, {transform_indices = @transform_12, window_bounds = array<i64: 1, 4, 16>}]} {
    %cst = arith.constant 0.000000e+00 : f32
    %0 = vector.broadcast %cst : f32 to vector<8x4xf32>
    %c0 = arith.constant 0 : index
    %c0_0 = arith.constant 0 : index
    %1 = vector.load %arg14[%c0, %c0_0] : memref<32x4xf32, #tpu.memory_space<vmem>>, vector<8x4xf32>
    tpu.vector_store %arg14[%c0, %c0_0], %0 {strides = array<i32>} : memref<32x4xf32, #tpu.memory_space<vmem>>, vector<8x4xf32>,
    %c24 = arith.constant 24 : index
    %c0_1 = arith.constant 0 : index
    %2 = vector.load %arg14[%c24, %c0_1] : memref<32x4xf32, #tpu.memory_space<vmem>>, vector<8x4xf32>
    tpu.vector_store %arg14[%c24, %c0_1], %0 {strides = array<i32>} : memref<32x4xf32, #tpu.memory_space<vmem>>, vector<8x4xf32>,
    %c0_2 = arith.constant 0 : index
    %c0_3 = arith.constant 0 : index
    %c0_4 = arith.constant 0 : index
    %3 = vector.load %arg1[%c0_2, %c0_3, %c0_4] : memref<1x16x4xf32, #tpu.memory_space<vmem>>, vector<1x16x4xf32>
    %4 = vector.shape_cast %3 : vector<1x16x4xf32> to vector<16x4xf32>
    %c8 = arith.constant 8 : index
    %c0_5 = arith.constant 0 : index
    %5 = vector.load %arg14[%c8, %c0_5] : memref<32x4xf32, #tpu.memory_space<vmem>>, vector<16x4xf32>
    tpu.vector_store %arg14[%c8, %c0_5], %4 {strides = array<i32>} : memref<32x4xf32, #tpu.memory_space<vmem>>, vector<16x4xf32>,
    %c0_6 = arith.constant 0 : index
    %c0_7 = arith.constant 0 : index
    %6 = vector.load %arg14[%c0_6, %c0_7] : memref<32x4xf32, #tpu.memory_space<vmem>>, vector<32x4xf32>
    %cst_8 = arith.constant 0.000000e+00 : f32
    %7 = vector.broadcast %cst_8 : f32 to vector<32x4xf32>
    %8 = arith.cmpf oge, %6, %7 : vector<32x4xf32>
    %cst_9 = arith.constant 2.500000e-01 : f32
    %9 = vector.broadcast %cst_9 : f32 to vector<32x4xf32>
    %10 = arith.mulf %9, %6 : vector<32x4xf32>
    %11 = arith.select %8, %6, %10 : vector<32x4xi1>, vector<32x4xf32>
    %12 = arith.truncf %11 : vector<32x4xf32> to vector<32x4xbf16>
    %13 = vector.extract_strided_slice %12 {offsets = [7, 0], sizes = [16, 4], strides = [1, 1]} : vector<32x4xbf16> to vector<16x4xbf16>
    %14 = vector.extract_strided_slice %12 {offsets = [8, 0], sizes = [16, 4], strides = [1, 1]} : vector<32x4xbf16> to vector<16x4xbf16>
    %15 = vector.extract_strided_slice %12 {offsets = [9, 0], sizes = [16, 4], strides = [1, 1]} : vector<32x4xbf16> to vector<16x4xbf16>
    %16 = tpu.concatenate %13, %14, %15 in 1 : vector<16x4xbf16>, vector<16x4xbf16>, vector<16x4xbf16> -> vector<16x12xbf16>
    %c0_10 = arith.constant 0 : index
    %c0_11 = arith.constant 0 : index
    %17 = vector.load %arg2[%c0_10, %c0_11] : memref<12x4xbf16, #tpu.memory_space<vmem>>, vector<12x4xbf16>
    %cst_12 = arith.constant dense<0.000000e+00> : vector<16x4xf32>
    %18 = tpu.matmul %16, %17, %cst_12 {dimension_numbers = #tpu.dot_dimension_numbers<[1], [0], [0], [1], [0, 0, 1, 1], [], []>} : vector<16x12xbf16>, vector<12x4xbf16>, vector<16x4xf32> -> vector<16x4xf32>
    %c8_13 = arith.constant 8 : index
    %c0_14 = arith.constant 0 : index
    %19 = vector.load %arg14[%c8_13, %c0_14] : memref<32x4xf32, #tpu.memory_space<vmem>>, vector<16x4xf32>
    %20 = arith.addf %19, %18 : vector<16x4xf32>
    %c0_15 = arith.constant 0 : index
    %c0_16 = arith.constant 0 : index
    %21 = vector.load %arg3[%c0_15, %c0_16] : memref<1x4xf32, #tpu.memory_space<vmem>>, vector<1x4xf32>
    %22 = vector.broadcast %21 : vector<1x4xf32> to vector<16x4xf32>
    %23 = arith.addf %20, %22 : vector<16x4xf32>
    %c8_17 = arith.constant 8 : index
    %c0_18 = arith.constant 0 : index
    %24 = vector.load %arg14[%c8_17, %c0_18] : memref<32x4xf32, #tpu.memory_space<vmem>>, vector<16x4xf32>
    tpu.vector_store %arg14[%c8_17, %c0_18], %23 {strides = array<i32>} : memref<32x4xf32, #tpu.memory_space<vmem>>, vector<16x4xf32>,
    %c0_19 = arith.constant 0 : index
    %c0_20 = arith.constant 0 : index
    %25 = vector.load %arg14[%c0_19, %c0_20] : memref<32x4xf32, #tpu.memory_space<vmem>>, vector<32x4xf32>
    %cst_21 = arith.constant 0.000000e+00 : f32
    %26 = vector.broadcast %cst_21 : f32 to vector<32x4xf32>
    %27 = arith.cmpf oge, %25, %26 : vector<32x4xf32>
    %cst_22 = arith.constant 2.500000e-01 : f32
    %28 = vector.broadcast %cst_22 : f32 to vector<32x4xf32>
    %29 = arith.mulf %28, %25 : vector<32x4xf32>
    %30 = arith.select %27, %25, %29 : vector<32x4xi1>, vector<32x4xf32>
    %31 = arith.truncf %30 : vector<32x4xf32> to vector<32x4xbf16>
    %32 = vector.extract_strided_slice %31 {offsets = [6, 0], sizes = [16, 4], strides = [1, 1]} : vector<32x4xbf16> to vector<16x4xbf16>
    %33 = vector.extract_strided_slice %31 {offsets = [8, 0], sizes = [16, 4], strides = [1, 1]} : vector<32x4xbf16> to vector<16x4xbf16>
    %34 = vector.extract_strided_slice %31 {offsets = [10, 0], sizes = [16, 4], strides = [1, 1]} : vector<32x4xbf16> to vector<16x4xbf16>
    %35 = tpu.concatenate %32, %33, %34 in 1 : vector<16x4xbf16>, vector<16x4xbf16>, vector<16x4xbf16> -> vector<16x12xbf16>
    %c0_23 = arith.constant 0 : index
    %c0_24 = arith.constant 0 : index
    %36 = vector.load %arg4[%c0_23, %c0_24] : memref<12x4xbf16, #tpu.memory_space<vmem>>, vector<12x4xbf16>
    %cst_25 = arith.constant dense<0.000000e+00> : vector<16x4xf32>
    %37 = tpu.matmul %35, %36, %cst_25 {dimension_numbers = #tpu.dot_dimension_numbers<[1], [0], [0], [1], [0, 0, 1, 1], [], []>} : vector<16x12xbf16>, vector<12x4xbf16>, vector<16x4xf32> -> vector<16x4xf32>
    %c8_26 = arith.constant 8 : index
    %c0_27 = arith.constant 0 : index
    %38 = vector.load %arg14[%c8_26, %c0_27] : memref<32x4xf32, #tpu.memory_space<vmem>>, vector<16x4xf32>
    %39 = arith.addf %38, %37 : vector<16x4xf32>
    %c0_28 = arith.constant 0 : index
    %c0_29 = arith.constant 0 : index
    %40 = vector.load %arg5[%c0_28, %c0_29] : memref<1x4xf32, #tpu.memory_space<vmem>>, vector<1x4xf32>
    %41 = vector.broadcast %40 : vector<1x4xf32> to vector<16x4xf32>
    %42 = arith.addf %39, %41 : vector<16x4xf32>
    %c8_30 = arith.constant 8 : index
    %c0_31 = arith.constant 0 : index
    %43 = vector.load %arg14[%c8_30, %c0_31] : memref<32x4xf32, #tpu.memory_space<vmem>>, vector<16x4xf32>
    tpu.vector_store %arg14[%c8_30, %c0_31], %42 {strides = array<i32>} : memref<32x4xf32, #tpu.memory_space<vmem>>, vector<16x4xf32>,
    %c0_32 = arith.constant 0 : index
    %c0_33 = arith.constant 0 : index
    %44 = vector.load %arg14[%c0_32, %c0_33] : memref<32x4xf32, #tpu.memory_space<vmem>>, vector<32x4xf32>
    %cst_34 = arith.constant 0.000000e+00 : f32
    %45 = vector.broadcast %cst_34 : f32 to vector<32x4xf32>
    %46 = arith.cmpf oge, %44, %45 : vector<32x4xf32>
    %cst_35 = arith.constant 2.500000e-01 : f32
    %47 = vector.broadcast %cst_35 : f32 to vector<32x4xf32>
    %48 = arith.mulf %47, %44 : vector<32x4xf32>
    %49 = arith.select %46, %44, %48 : vector<32x4xi1>, vector<32x4xf32>
    %50 = arith.truncf %49 : vector<32x4xf32> to vector<32x4xbf16>
    %51 = vector.extract_strided_slice %50 {offsets = [4, 0], sizes = [16, 4], strides = [1, 1]} : vector<32x4xbf16> to vector<16x4xbf16>
    %52 = vector.extract_strided_slice %50 {offsets = [8, 0], sizes = [16, 4], strides = [1, 1]} : vector<32x4xbf16> to vector<16x4xbf16>
    %53 = vector.extract_strided_slice %50 {offsets = [12, 0], sizes = [16, 4], strides = [1, 1]} : vector<32x4xbf16> to vector<16x4xbf16>
    %54 = tpu.concatenate %51, %52, %53 in 1 : vector<16x4xbf16>, vector<16x4xbf16>, vector<16x4xbf16> -> vector<16x12xbf16>
    %c0_36 = arith.constant 0 : index
    %c0_37 = arith.constant 0 : index
    %55 = vector.load %arg6[%c0_36, %c0_37] : memref<12x4xbf16, #tpu.memory_space<vmem>>, vector<12x4xbf16>
    %cst_38 = arith.constant dense<0.000000e+00> : vector<16x4xf32>
    %56 = tpu.matmul %54, %55, %cst_38 {dimension_numbers = #tpu.dot_dimension_numbers<[1], [0], [0], [1], [0, 0, 1, 1], [], []>} : vector<16x12xbf16>, vector<12x4xbf16>, vector<16x4xf32> -> vector<16x4xf32>
    %c8_39 = arith.constant 8 : index
    %c0_40 = arith.constant 0 : index
    %57 = vector.load %arg14[%c8_39, %c0_40] : memref<32x4xf32, #tpu.memory_space<vmem>>, vector<16x4xf32>
    %58 = arith.addf %57, %56 : vector<16x4xf32>
    %c0_41 = arith.constant 0 : index
    %c0_42 = arith.constant 0 : index
    %59 = vector.load %arg7[%c0_41, %c0_42] : memref<1x4xf32, #tpu.memory_space<vmem>>, vector<1x4xf32>
    %60 = vector.broadcast %59 : vector<1x4xf32> to vector<16x4xf32>
    %61 = arith.addf %58, %60 : vector<16x4xf32>
    %c8_43 = arith.constant 8 : index
    %c0_44 = arith.constant 0 : index
    %62 = vector.load %arg14[%c8_43, %c0_44] : memref<32x4xf32, #tpu.memory_space<vmem>>, vector<16x4xf32>
    tpu.vector_store %arg14[%c8_43, %c0_44], %61 {strides = array<i32>} : memref<32x4xf32, #tpu.memory_space<vmem>>, vector<16x4xf32>,
    %c8_45 = arith.constant 8 : index
    %c0_46 = arith.constant 0 : index
    %63 = tpu.strided_load %arg14[%c8_45, %c0_46] {strides = array<i32: 2, 1>} : memref<32x4xf32, #tpu.memory_space<vmem>>, vector<8x4xf32>
    %c9 = arith.constant 9 : index
    %c0_47 = arith.constant 0 : index
    %64 = tpu.strided_load %arg14[%c9, %c0_47] {strides = array<i32: 2, 1>} : memref<32x4xf32, #tpu.memory_space<vmem>>, vector<8x4xf32>
    %65 = tpu.concatenate %63, %64 in 1 : vector<8x4xf32>, vector<8x4xf32> -> vector<8x8xf32>
    %cst_48 = arith.constant 0.000000e+00 : f32
    %66 = vector.broadcast %cst_48 : f32 to vector<8x8xf32>
    %67 = arith.cmpf oge, %65, %66 : vector<8x8xf32>
    %cst_49 = arith.constant 2.500000e-01 : f32
    %68 = vector.broadcast %cst_49 : f32 to vector<8x8xf32>
    %69 = arith.mulf %68, %65 : vector<8x8xf32>
    %70 = arith.select %67, %65, %69 : vector<8x8xi1>, vector<8x8xf32>
    %71 = arith.truncf %70 : vector<8x8xf32> to vector<8x8xbf16>
    %c0_50 = arith.constant 0 : index
    %c0_51 = arith.constant 0 : index
    %72 = vector.load %arg8[%c0_50, %c0_51] : memref<8x8xbf16, #tpu.memory_space<vmem>>, vector<8x8xbf16>
    %cst_52 = arith.constant dense<0.000000e+00> : vector<8x8xf32>
    %73 = tpu.matmul %71, %72, %cst_52 {dimension_numbers = #tpu.dot_dimension_numbers<[1], [0], [0], [1], [0, 0, 1, 1], [], []>} : vector<8x8xbf16>, vector<8x8xbf16>, vector<8x8xf32> -> vector<8x8xf32>
    %c0_53 = arith.constant 0 : index
    %c0_54 = arith.constant 0 : index
    %74 = vector.load %arg9[%c0_53, %c0_54] : memref<1x8xf32, #tpu.memory_space<vmem>>, vector<1x8xf32>
    %75 = vector.broadcast %74 : vector<1x8xf32> to vector<8x8xf32>
    %76 = arith.addf %73, %75 : vector<8x8xf32>
    %c0_55 = arith.constant 0 : index
    %c0_56 = arith.constant 0 : index
    %c0_57 = arith.constant 0 : index
    %77 = vector.load %arg12[%c0_55, %c0_56, %c0_57] : memref<1x8x8xf32, #tpu.memory_space<vmem>>, vector<1x8x8xf32>
    %78 = vector.shape_cast %77 : vector<1x8x8xf32> to vector<8x8xf32>
    %79 = vector.shape_cast %76 : vector<8x8xf32> to vector<1x8x8xf32>
    tpu.vector_store %arg12[%c0_55, %c0_56, %c0_57], %79 {strides = array<i32>} : memref<1x8x8xf32, #tpu.memory_space<vmem>>, vector<1x8x8xf32>,
    %c8_58 = arith.constant 8 : index
    %c0_59 = arith.constant 0 : index
    %80 = tpu.strided_load %arg14[%c8_58, %c0_59] {strides = array<i32: 4, 1>} : memref<32x4xf32, #tpu.memory_space<vmem>>, vector<4x4xf32>
    %c9_60 = arith.constant 9 : index
    %c0_61 = arith.constant 0 : index
    %81 = tpu.strided_load %arg14[%c9_60, %c0_61] {strides = array<i32: 4, 1>} : memref<32x4xf32, #tpu.memory_space<vmem>>, vector<4x4xf32>
    %c10 = arith.constant 10 : index
    %c0_62 = arith.constant 0 : index
    %82 = tpu.strided_load %arg14[%c10, %c0_62] {strides = array<i32: 4, 1>} : memref<32x4xf32, #tpu.memory_space<vmem>>, vector<4x4xf32>
    %c11 = arith.constant 11 : index
    %c0_63 = arith.constant 0 : index
    %83 = tpu.strided_load %arg14[%c11, %c0_63] {strides = array<i32: 4, 1>} : memref<32x4xf32, #tpu.memory_space<vmem>>, vector<4x4xf32>
    %84 = tpu.concatenate %80, %81, %82, %83 in 1 : vector<4x4xf32>, vector<4x4xf32>, vector<4x4xf32>, vector<4x4xf32> -> vector<4x16xf32>
    %cst_64 = arith.constant 0.000000e+00 : f32
    %85 = vector.broadcast %cst_64 : f32 to vector<4x16xf32>
    %86 = arith.cmpf oge, %84, %85 : vector<4x16xf32>
    %cst_65 = arith.constant 2.500000e-01 : f32
    %87 = vector.broadcast %cst_65 : f32 to vector<4x16xf32>
    %88 = arith.mulf %87, %84 : vector<4x16xf32>
    %89 = arith.select %86, %84, %88 : vector<4x16xi1>, vector<4x16xf32>
    %90 = arith.truncf %89 : vector<4x16xf32> to vector<4x16xbf16>
    %c0_66 = arith.constant 0 : index
    %c0_67 = arith.constant 0 : index
    %91 = vector.load %arg10[%c0_66, %c0_67] : memref<16x16xbf16, #tpu.memory_space<vmem>>, vector<16x16xbf16>
    %cst_68 = arith.constant dense<0.000000e+00> : vector<4x16xf32>
    %92 = tpu.matmul %90, %91, %cst_68 {dimension_numbers = #tpu.dot_dimension_numbers<[1], [0], [0], [1], [0, 0, 1, 1], [], []>} : vector<4x16xbf16>, vector<16x16xbf16>, vector<4x16xf32> -> vector<4x16xf32>
    %c0_69 = arith.constant 0 : index
    %c0_70 = arith.constant 0 : index
    %93 = vector.load %arg11[%c0_69, %c0_70] : memref<1x16xf32, #tpu.memory_space<vmem>>, vector<1x16xf32>
    %94 = vector.broadcast %93 : vector<1x16xf32> to vector<4x16xf32>
    %95 = arith.addf %92, %94 : vector<4x16xf32>
    %c0_71 = arith.constant 0 : index
    %c0_72 = arith.constant 0 : index
    %c0_73 = arith.constant 0 : index
    %96 = vector.load %arg13[%c0_71, %c0_72, %c0_73] : memref<1x4x16xf32, #tpu.memory_space<vmem>>, vector<1x4x16xf32>
    %97 = vector.shape_cast %96 : vector<1x4x16xf32> to vector<4x16xf32>
    %98 = vector.shape_cast %95 : vector<4x16xf32> to vector<1x4x16xf32>
    tpu.vector_store %arg13[%c0_71, %c0_72, %c0_73], %98 {strides = array<i32>} : memref<1x4x16xf32, #tpu.memory_space<vmem>>, vector<1x4x16xf32>,
    return
  }
  func.func @transform_0(%arg0: i32) -> (i32, i32, i32) {
    %c0_i32 = arith.constant 0 : i32
    %c0_i32_0 = arith.constant 0 : i32
    %c0_i32_1 = arith.constant 0 : i32
    return %arg0, %c0_i32, %c0_i32_0 : i32, i32, i32
  }
  func.func @transform_1(%arg0: i32) -> (i32, i32) {
    %c0_i32 = arith.constant 0 : i32
    %c0_i32_0 = arith.constant 0 : i32
    %c0_i32_1 = arith.constant 0 : i32
    return %c0_i32, %c0_i32_0 : i32, i32
  }
  func.func @transform_2(%arg0: i32) -> (i32, i32) {
    %c0_i32 = arith.constant 0 : i32
    %c0_i32_0 = arith.constant 0 : i32
    %c0_i32_1 = arith.constant 0 : i32
    return %c0_i32, %c0_i32_0 : i32, i32
  }
  func.func @transform_3(%arg0: i32) -> (i32, i32) {
    %c0_i32 = arith.constant 0 : i32
    %c0_i32_0 = arith.constant 0 : i32
    %c0_i32_1 = arith.constant 0 : i32
    return %c0_i32, %c0_i32_0 : i32, i32
  }
  func.func @transform_4(%arg0: i32) -> (i32, i32) {
    %c0_i32 = arith.constant 0 : i32
    %c0_i32_0 = arith.constant 0 : i32
    %c0_i32_1 = arith.constant 0 : i32
    return %c0_i32, %c0_i32_0 : i32, i32
  }
  func.func @transform_5(%arg0: i32) -> (i32, i32) {
    %c0_i32 = arith.constant 0 : i32
    %c0_i32_0 = arith.constant 0 : i32
    %c0_i32_1 = arith.constant 0 : i32
    return %c0_i32, %c0_i32_0 : i32, i32
  }
  func.func @transform_6(%arg0: i32) -> (i32, i32) {
    %c0_i32 = arith.constant 0 : i32
    %c0_i32_0 = arith.constant 0 : i32
    %c0_i32_1 = arith.constant 0 : i32
    return %c0_i32, %c0_i32_0 : i32, i32
  }
  func.func @transform_7(%arg0: i32) -> (i32, i32) {
    %c0_i32 = arith.constant 0 : i32
    %c0_i32_0 = arith.constant 0 : i32
    %c0_i32_1 = arith.constant 0 : i32
    return %c0_i32, %c0_i32_0 : i32, i32
  }
  func.func @transform_8(%arg0: i32) -> (i32, i32) {
    %c0_i32 = arith.constant 0 : i32
    %c0_i32_0 = arith.constant 0 : i32
    %c0_i32_1 = arith.constant 0 : i32
    return %c0_i32, %c0_i32_0 : i32, i32
  }
  func.func @transform_9(%arg0: i32) -> (i32, i32) {
    %c0_i32 = arith.constant 0 : i32
    %c0_i32_0 = arith.constant 0 : i32
    %c0_i32_1 = arith.constant 0 : i32
    return %c0_i32, %c0_i32_0 : i32, i32
  }
  func.func @transform_10(%arg0: i32) -> (i32, i32) {
    %c0_i32 = arith.constant 0 : i32
    %c0_i32_0 = arith.constant 0 : i32
    %c0_i32_1 = arith.constant 0 : i32
    return %c0_i32, %c0_i32_0 : i32, i32
  }
  func.func @transform_11(%arg0: i32) -> (i32, i32, i32) {
    %c0_i32 = arith.constant 0 : i32
    %c0_i32_0 = arith.constant 0 : i32
    %c0_i32_1 = arith.constant 0 : i32
    return %arg0, %c0_i32, %c0_i32_0 : i32, i32, i32
  }
  func.func @transform_12(%arg0: i32) -> (i32, i32, i32) {
    %c0_i32 = arith.constant 0 : i32
    %c0_i32_0 = arith.constant 0 : i32
    %c0_i32_1 = arith.constant 0 : i32
    return %arg0, %c0_i32, %c0_i32_0 : i32, i32, i32
  }
}

</mosaic_0001>

<bundles_post_ra>
// kernel: tpu_custom_call.1
= control target key start
LH: loop header
LB: loop body
LE: loop exit
PB: predicated region body
PF: predicated region fallthrough
CT: control target
= control target key end

     0   :  { %s1642_s0 = inlined_call_operand.vmem [shape: f32[2,16,4], index: 0, kind: input, shape index: {}]   ;;  %s1643_s1 = inlined_call_operand.vmem [shape: bf16[12,4], index: 1, kind: input, shape index: {}]   ;;  %s1644_s2 = inlined_call_operand.vmem [shape: f32[1,4], index: 2, kind: input, shape index: {}]   ;;  %s1645_s3 = inlined_call_operand.vmem [shape: bf16[12,4], index: 3, kind: input, shape index: {}]   ;;  %s1646_s4 = inlined_call_operand.vmem [shape: f32[1,4], index: 4, kind: input, shape index: {}]   ;;  %s1647_s5 = inlined_call_operand.vmem [shape: bf16[12,4], index: 5, kind: input, shape index: {}]   ;;  %s1648_s6 = inlined_call_operand.vmem [shape: f32[1,4], index: 6, kind: input, shape index: {}]   ;;  %s1649_s7 = inlined_call_operand.vmem [shape: bf16[8,8], index: 7, kind: input, shape index: {}]   ;;  %s1650_s8 = inlined_call_operand.vmem [shape: f32[1,8], index: 8, kind: input, shape index: {}]   ;;  %s1651_s9 = inlined_call_operand.vmem [shape: bf16[16,16], index: 9, kind: input, shape index: {}]   ;;  %s1652_s10 = inlined_call_operand.vmem [shape: f32[1,16], index: 10, kind: input, shape index: {}]   ;;  %s1653_s11 = inlined_call_operand.hbm [shape: f32[2,8,8], index: 11, kind: output, shape index: {0}]   ;;  %s1654_s12 = inlined_call_operand.hbm [shape: f32[2,4,16], index: 12, kind: output, shape index: {1}]  }
   0x1   :  { %1655 = sst [smem:[#allocation9_spill]] %s1642_s0 }
   0x2   :  { %1656 = sst [smem:[#allocation10_spill]] %s1643_s1 }
   0x3   :  { %1657 = sst [smem:[#allocation11_spill]] %s1644_s2 }
   0x4   :  { %1658 = sst [smem:[#allocation12_spill]] %s1645_s3 }
   0x5   :  { %1659 = sst [smem:[#allocation13_spill]] %s1646_s4 }
   0x6   :  { %1660 = sst [smem:[#allocation14_spill]] %s1647_s5 }
   0x7   :  { %1661 = sst [smem:[#allocation15_spill]] %s1648_s6 }
   0x8   :  { %18 = vsyncpa [#allocation4], 0 }
   0x9   :  { %20 = vsyncpa [#allocation4 + $0x1], 0 }
   0xa   :  { %21 = vsyncpa [#allocation6], 0 }
   0xb   :  { %23 = vsyncpa [#allocation6 + $0x1], 0  ;;  %s1382_s21 = smov 0   ;;  %s1384_s22 = smov 0  }
   0xc   :  { %s1386_s23 = smov 0   ;;  %s1388_s24 = smov 0  }
   0xd LB: > { %s1403_s25 = sadd.s32 4294967295, %s1308_s24   ;;  %s1092_s26 = sadd.s32 4294967294, %s1308_s24   ;;  %s1308_s24 = sphi %s1388_s24, %s1674_s24   ;;  %s1304_s23 = sphi %s1386_s23, %s1673_s23   ;;  %s1300_s22 = sphi %s1384_s22, %s1672_s22   ;;  %s1296_s21 = sphi %s1382_s21, %s1671_s21  }
   0xe   : > { %s1407_s27 = sadd.s32 1, %s1308_s24   ;;  %s272_s28 = sadd.s32 1, %s1304_s23 }
   0xf   : > { %s269_s29 = ssub.s32 %s1308_s24, %s1407_s27  ;;  %p282_p0 = scmp.ne.s32.totalorder %s1304_s23, %s1300_s22 }
  0x10   : > { %p270_p1 = scmp.eq.s32.totalorder %s269_s29, 0  ;;  %p283_p2 = scmp.eq.s32.totalorder %s1403_s25, 1 }
  0x11   : > { %p288_p3 = scmp.ne.s32.totalorder %s1300_s22, %s1296_s21  ;;  %p289_p4 = scmp.eq.s32.totalorder %s1092_s26, 1 }
  0x12   : > { %s1418_s30 = scalar_select %p270_p1, %s1304_s23, %s272_s28  }
  0x13   : > { %p1420_p5 = por %p283_p2, %p282_p0  ;;  %p1424_p6 = por %p289_p4, %p288_p3 }
  0x14   : > { %p1095_p7 = scmp.ge.s32.totalorder %s1308_s24, 1  ;;  %p371_p8 = scmp.lt.s32.totalorder %s1308_s24, 3 }
  0x16   : > { %p372_p9 = pnand %p1095_p7, %p371_p8 }
  0x17   : > { %p418_p10 = scmp.lt.s32.totalorder (!%p372_p9), %s1403_s25, 1  ;;  %vm424_vm0 = vcmask (!%p372_p9), 31744   ;;  %v1310_v0 = vmov (!%p372_p9), 0.0   ;;  %s1664_s0 = sld [smem:[#allocation9_spill]] (!%p372_p9)  ;;  %vm471_vm5 = vcmask (!%p372_p9), 1046528   ;;  %vm515_vm6 = vcmask (!%p372_p9), 1045504  }
  0x18   : > { %375 = sbr.rel (%p372_p9) target bundleno = 1501 (0x5dd), region = 64  ;;  %425 = vst.msk [vmem:[#allocation2] sm:$0xff] (!%p372_p9), %vm424_vm0, %v1310_v0  ;;  %426 = vst.msk [vmem:[#allocation2 + $0x18] sm:$0xff] (!%p372_p9), %vm424_vm0, %v1310_v0  ;;  %1131 = vmatprep.subr.bf16.mxu0 (!%p372_p9), %v1310_v0  ;;  %1137 = vmatprep.subr.bf16.mxu1 (!%p372_p9), %v1310_v0  ;;  %s1665_s1 = sld [smem:[#allocation10_spill]] (!%p372_p9)  ;;  %vm449_vm7 = vsmask.f32 (!%p372_p9), 7424 }
  0x19   : > { %s1311_s28 = smov (!%p372_p9), 8   ;;  %vm1312_vm8 = vmmov (!%p372_p9), 0   ;;  %s1313_s29 = smov (!%p372_p9), 4   ;;  %vm483_vm9 = vcmask (!%p372_p9), 64512   ;;  %vm490_vm10 = vsmask.f32 (!%p372_p9), 4352 }
  0x1a   : > { %1133 = vmatprep.mubr.msk.bf16.mxu0 (!%p372_p9), %vm1312_vm8, %v1310_v0  ;;  %1139 = vmatprep.mubr.msk.bf16.mxu1 (!%p372_p9), %vm1312_vm8, %v1310_v0  ;;  %vm511_vm11 = vcmask (!%p372_p9), 97280   ;;  %s1666_s2 = sld [smem:[#allocation11_spill]] (!%p372_p9)  ;;  %s1667_s3 = sld [smem:[#allocation12_spill]] (!%p372_p9)  ;;  %vm624_vm14 = vcmask (!%p372_p9), 1044480  }
  0x1b   : > { %s1668_s4 = sld [smem:[#allocation13_spill]] (!%p372_p9)  ;;  %s1669_s5 = sld [smem:[#allocation14_spill]] (!%p372_p9) }
  0x1c   : > { %s1670_s6 = sld [smem:[#allocation15_spill]] (!%p372_p9)  ;;  %s1116_s17 = sshll.u32 (!%p372_p9), %s1403_s25, 7 }
  0x1e   : > { %v1210_v22 = vld [vmem:[%s1665_s1] sm:$0x3f] (!%p372_p9)   ;;  %s1117_s1 = sshll.u32 (!%p372_p9), %s1403_s25, 6 }
  0x1f   : > { %s419_s15 = scalar_select %p418_p10, %s1403_s25, 1  ;;  %v431_v3 = vld [vmem:[#allocation2] sm:$0xff]  ;;  %v434_v4 = vld [vmem:[#allocation2 + $0x18] sm:$0xff]  ;;  %v517_v27 = vsel %vm515_vm6, %v1210_v22, 0 }
  0x20   : > { %v439_v5 = vmul.f32 0.25, %v431_v3  ;;  %v442_v6 = vmul.f32 0.25, %v434_v4  ;;  %vm435_vm1 = vcmp.ge.f32.partialorder %v431_v3, 0.0  ;;  %vm438_vm2 = vcmp.ge.f32.partialorder %v434_v4, 0.0  ;;  %1132 = vmatpush3.bf16.msra.mxu0 %v517_v27  ;;  %v1102_v51 = vld [vmem:[%s1666_s2] ss:$0 sm:$0xff] }
  0x21   : > { %s1120_s16 = sshll.u32 %s419_s15, 4  ;;  %1143 = vmatprep.subr.bf16.mxu0 %v1310_v0  ;;  %v1211_v60 = vld [vmem:[%s1667_s3] sm:$0x3f]   ;;  %s1314_s15 = smov 12  }
  0x22   : > { %s422_s19 = scalar_lea.vmem %s1664_s0, %s1120_s16  ;;  %v1447_v9 = vsel %vm435_vm1, %v431_v3, %v439_v5  ;;  %v1449_v10 = vsel %vm438_vm2, %v434_v4, %v442_v6  ;;  %v637_v63 = vsel %vm515_vm6, %v1211_v60, 0  ;;  %vm722_vm2 = vcmask 1043456   ;;  %v1108_v60 = vld [vmem:[%s1670_s6] ss:$0 sm:$0xff]  ;;  %s1569_s6 = scalar_lea.hbm %s1653_s11, %s1116_s17 }
  0x23   : > { %v427_v1 = vld [vmem:[%s422_s19] sm:$0xff]  ;;  %v428_v2 = vld [vmem:[%s422_s19 + $0x8] sm:$0xff]  ;;  %1138 = vmatpush3.bf16.msra.mxu1 %v637_v63  ;;  %s1315_s17 = smov [#allocation3]  }
  0x24   : > { %429 = vst.msk [vmem:[#allocation2 + $0x8] sm:$0xff] %vm424_vm0, %v427_v1  ;;  %430 = vst.msk [vmem:[#allocation2 + $0x10] sm:$0xff] %vm424_vm0, %v428_v2  ;;  %1149 = vmatprep.subr.bf16.mxu1 %v1310_v0  ;;  %s1218_s18 = sshll.u32 %s1315_s17, 4  ;;  %s1219_s18 = int_to_ptr.vmem [resolvable:$false] %s1218_s18 }
  0x25   : > { %s1220_s19 = scalar_lea.vmem %s1219_s18, 256 }
  0x2b   : > { %v1443_v7 = vld [vmem:[#allocation2 + $0x8] sm:$0xff]  ;;  %v1445_v8 = vld [vmem:[#allocation2 + $0x10] sm:$0xff] }
  0x2c   : > { %vm436_vm3 = vcmp.ge.f32.partialorder %v1443_v7, 0.0  ;;  %vm437_vm4 = vcmp.ge.f32.partialorder %v1445_v8, 0.0  ;;  %v440_v11 = vmul.f32 0.25, %v1443_v7  ;;  %v441_v12 = vmul.f32 0.25, %v1445_v8 }
  0x2e   : > { %v444_v13 = vsel %vm436_vm3, %v1443_v7, %v440_v11  ;;  %v445_v14 = vsel %vm437_vm4, %v1445_v8, %v441_v12 }
  0x2f   : > { %v447_v15 = vpack.c.bf16 %v444_v13, %v1447_v9  ;;  %v448_v16 = vpack.c.bf16 %v1449_v10, %v445_v14 }
  0x31   : > { %v451_v17 = vshrl.u32 %v447_v15, 16  ;;  %v453_v18 = vshll.u32 %v447_v15, 16  ;;  %v458_v19 = vshll.u32 %v448_v16, 16  ;;  %v472_v20 = vrot.slane %v447_v15, 1 }
  0x32   : > { %v473_v21 = vrot.slane %v448_v16, 1  ;;  %v462_v26 = vshrl.u32 %v448_v16, 16 }
  0x33   : > { %v455_v23 = vrot.slane %v453_v18, 1  ;;  %v460_v24 = vrot.slane %v458_v19, 1 }
  0x34   : > { %v474_v25 = vsel %vm471_vm5, %v472_v20, %v473_v21 }
  0x35   : > { %v456_v28 = vor.u32 %v455_v23, %v451_v17  ;;  %475 = vrot.lane.b32.xlu1 %v474_v25, %s1311_s28  ;;  %v464_v30 = vor.u32 %v462_v26, %v460_v24  ;;  %v1105_v26 = vld [vmem:[%s1668_s4] ss:$0 sm:$0xff]  ;;  %s1576_s4 = scalar_lea.hbm %s1654_s12, %s1117_s1 }
  0x37   : > { %v461_v29 = vsel %vm449_vm7, %v456_v28, %v460_v24 }
  0x38   : > { %465 = vrot.lane.b32.xlu0 %v461_v29, %s1313_s29 }
  0x39   : > { %477 = vrot.lane.b32.xlu1 %v473_v21, %s1311_s28 }
  0x3c   : > { %467 = vrot.lane.b32.xlu0 %v464_v30, %s1313_s29 }
  0xa7   : > { %v476_v31 = vpop.permute.xlu1 %475 }
  0xaa   : > { %v466_v32 = vpop.permute.xlu0 %465 }
  0xab   : > { %v480_v33 = vsel %vm424_vm0, %v447_v15, %v466_v32  ;;  %v478_v37 = vpop.permute.xlu1 %477 }
  0xac   : > { %v485_v34 = vsel %vm483_vm9, %v480_v33, %v476_v31 }
  0xad   : > { %v491_v35 = vshrl.u32 %v485_v34, 16  ;;  %v494_v36 = vshll.u32 %v485_v34, 16  ;;  %v1212_v34 = vld [vmem:[%s1669_s5] sm:$0x3f]  }
  0xae   : > { %v468_v38 = vpop.permute.xlu0 %467 }
  0xaf   : > { %v482_v39 = vsel %vm424_vm0, %v448_v16, %v468_v38  ;;  %v493_v41 = vrot.slane %v491_v35, 3  ;;  %v496_v42 = vrot.slane %v494_v36, 4  ;;  %v756_v36 = vsel %vm515_vm6, %v1212_v34, 0 }
  0xb0   : > { %v487_v40 = vsel %vm483_vm9, %v482_v39, %v478_v37 }
  0xb1   : > { %v498_v43 = vshrl.u32 %v487_v40, 16  ;;  %v501_v44 = vshll.u32 %v487_v40, 16  ;;  %v497_v47 = vor.u32 %v496_v42, %v493_v41 }
  0xb3   : > { %v500_v45 = vrot.slane %v498_v43, 3  ;;  %v503_v46 = vrot.slane %v501_v44, 4 }
  0xb5   : > { %v504_v48 = vor.u32 %v503_v46, %v500_v45 }
  0xb7   : > { %v505_v49 = vsel %vm490_vm10, %v497_v47, %v504_v48 }
  0xb8   : > { %1134 = vmatmul.mubr.msk.bf16.vlgmr.msra.gmra.mrb[0].mxu0 %vm511_vm11, %v505_v49 }
  0xb9   : > { %1145 = vmatprep.mubr.msk.bf16.mxu0 %vm1312_vm8, %v1310_v0  ;;  %1144 = vmatpush3.bf16.msra.mxu0 %v756_v36 }
  0xba   : > { %1155 = vmatprep.subr.bf16.mxu0 %v1310_v0 }
 0x18b   : > { %v553_v50 = vpop.f32.mrb[0].mxu0 }
 0x18c   : > { %v562_v52 = vadd.f32 %v553_v50, %v1443_v7  ;;  %v1135_v53 = vpop.f32.mrb[1].mxu0 }
 0x18d   : > { %v556_v54 = vpop.f32.mrb[2].mxu0 }
 0x18e   : > { %v571_v55 = vadd.f32 %v1102_v51, %v562_v52  ;;  %v563_v56 = vadd.f32 %v556_v54, %v1445_v8  ;;  %v1136_v57 = vpop.f32.mrb[3].mxu0 }
 0x190   : > { %573 = vst.msk [vmem:[#allocation2 + $0x8] sm:$0xff] %vm424_vm0, %v571_v55  ;;  %v572_v58 = vadd.f32 %v1102_v51, %v563_v56 }
 0x192   : > { %574 = vst.msk [vmem:[#allocation2 + $0x10] sm:$0xff] %vm424_vm0, %v572_v58 }
 0x197   : > { %v576_v59 = vld [vmem:[#allocation2 + $0x8] sm:$0xff] }
 0x198   : > { %vm580_vm12 = vcmp.ge.f32.partialorder %v576_v59, 0.0  ;;  %v584_v61 = vmul.f32 0.25, %v576_v59 }
 0x199   : > { %v577_v62 = vld [vmem:[#allocation2 + $0x10] sm:$0xff] }
 0x19a   : > { %vm581_vm13 = vcmp.ge.f32.partialorder %v577_v62, 0.0  ;;  %v585_v1 = vmul.f32 0.25, %v577_v62  ;;  %v588_v2 = vsel %vm580_vm12, %v576_v59, %v584_v61 }
 0x19b   : > { %v591_v3 = vpack.c.bf16 %v588_v2, %v1447_v9  ;;  %v1213_v2 = vld [vmem:[%s1651_s9] sm:$0xff]  }
 0x19c   : > { %v589_v4 = vsel %vm581_vm13, %v577_v62, %v585_v1  ;;  %v827_v1 = vld [vmem:[%s1649_s7] sm:$0xf] }
 0x19d   : > { %v592_v5 = vpack.c.bf16 %v1449_v10, %v589_v4  ;;  %v595_v7 = vrot.slane %v591_v3, 1  ;;  %v603_v12 = vrot.slane %v591_v3, 2 }
 0x19f   : > { %v596_v6 = vrot.slane %v592_v5, 1  ;;  %v604_v11 = vrot.slane %v592_v5, 2 }
 0x1a1   : > { %600 = vrot.lane.b32.xlu1 %v596_v6, %s1313_s29  ;;  %v597_v8 = vsel %vm471_vm5, %v595_v7, %v596_v6  ;;  %v605_v13 = vsel %vm515_vm6, %v603_v12, %v604_v11  ;;  %vm923_vm5 = vcmask 130048  }
 0x1a2   : > { %598 = vrot.lane.b32.xlu0 %v597_v8, %s1313_s29 }
 0x1a5   : > { %608 = vrot.lane.b32.xlu1 %v604_v11, %s1311_s28 }
 0x1a6   : > { %606 = vrot.lane.b32.xlu0 %v605_v13, %s1311_s28 }
 0x213   : > { %v601_v14 = vpop.permute.xlu1 %600 }
 0x214   : > { %v599_v15 = vpop.permute.xlu0 %598  ;;  %v615_v16 = vsel %vm424_vm0, %v592_v5, %v601_v14 }
 0x215   : > { %v612_v18 = vsel %vm424_vm0, %v591_v3, %v599_v15 }
 0x217   : > { %v609_v17 = vpop.permute.xlu1 %608 }
 0x218   : > { %v619_v19 = vsel %vm483_vm9, %v615_v16, %v609_v17  ;;  %v607_v20 = vpop.permute.xlu0 %606 }
 0x219   : > { %v626_v21 = vrot.slane %v619_v19, 3  ;;  %v617_v22 = vsel %vm483_vm9, %v612_v18, %v607_v20 }
 0x21a   : > { %v625_v23 = vrot.slane %v617_v22, 3 }
 0x21c   : > { %v627_v24 = vsel %vm624_vm14, %v625_v23, %v626_v21 }
 0x21d   : > { %1140 = vmatmul.mubr.msk.bf16.vlgmr.msra.gmra.mrb[0].mxu1 %vm511_vm11, %v627_v24 }
 0x21e   : > { %1151 = vmatprep.mubr.msk.bf16.mxu1 %vm1312_vm8, %v1310_v0 }
 0x2f0   : > { %v673_v25 = vpop.f32.mrb[0].mxu1 }
 0x2f1   : > { %v682_v27 = vadd.f32 %v673_v25, %v576_v59  ;;  %v1141_v28 = vpop.f32.mrb[1].mxu1 }
 0x2f2   : > { %v676_v29 = vpop.f32.mrb[2].mxu1 }
 0x2f3   : > { %v691_v30 = vadd.f32 %v1105_v26, %v682_v27  ;;  %v683_v31 = vadd.f32 %v676_v29, %v577_v62  ;;  %v1142_v32 = vpop.f32.mrb[3].mxu1  ;;  %v1109_v29 = vld [vmem:[%s1650_s8] ss:$0 sm:$0xff] }
 0x2f5   : > { %693 = vst.msk [vmem:[#allocation2 + $0x8] sm:$0xff] %vm424_vm0, %v691_v30  ;;  %v692_v33 = vadd.f32 %v1105_v26, %v683_v31  ;;  %v1111_v30 = vld [vmem:[%s1652_s10] ss:$0 sm:$0xff] }
 0x2f7   : > { %694 = vst.msk [vmem:[#allocation2 + $0x10] sm:$0xff] %vm424_vm0, %v692_v33 }
 0x2fc   : > { %v696_v35 = vld [vmem:[#allocation2 + $0x8] sm:$0xff] }
 0x2fd   : > { %vm700_vm15 = vcmp.ge.f32.partialorder %v696_v35, 0.0  ;;  %v704_v37 = vmul.f32 0.25, %v696_v35 }
 0x2fe   : > { %v697_v38 = vld [vmem:[#allocation2 + $0x10] sm:$0xff] }
 0x2ff   : > { %vm701_vm1 = vcmp.ge.f32.partialorder %v697_v38, 0.0  ;;  %v705_v39 = vmul.f32 0.25, %v697_v38  ;;  %v708_v40 = vsel %vm700_vm15, %v696_v35, %v704_v37 }
 0x300   : > { %v711_v41 = vpack.c.bf16 %v708_v40, %v1447_v9 }
 0x301   : > { %v709_v42 = vsel %vm701_vm1, %v697_v38, %v705_v39 }
 0x302   : > { %v712_v43 = vpack.c.bf16 %v1449_v10, %v709_v42  ;;  %v715_v45 = vrot.slane %v711_v41, 2  ;;  %v723_v48 = vrot.slane %v711_v41, 4 }
 0x304   : > { %v716_v44 = vrot.slane %v712_v43, 2  ;;  %v724_v47 = vrot.slane %v712_v43, 4 }
 0x306   : > { %720 = vrot.lane.b32.xlu1 %v716_v44, %s1313_s29  ;;  %v717_v46 = vsel %vm515_vm6, %v715_v45, %v716_v44  ;;  %v725_v49 = vsel %vm722_vm2, %v723_v48, %v724_v47 }
 0x307   : > { %718 = vrot.lane.b32.xlu0 %v717_v46, %s1313_s29 }
 0x30a   : > { %728 = vrot.lane.b32.xlu1 %v724_v47, %s1311_s28 }
 0x30b   : > { %726 = vrot.lane.b32.xlu0 %v725_v49, %s1311_s28 }
 0x378   : > { %v721_v9 = vpop.permute.xlu1 %720 }
 0x379   : > { %v719_v50 = vpop.permute.xlu0 %718  ;;  %v735_v10 = vsel %vm424_vm0, %v712_v43, %v721_v9 }
 0x37a   : > { %v732_v52 = vsel %vm424_vm0, %v711_v41, %v719_v50 }
 0x37c   : > { %v729_v51 = vpop.permute.xlu1 %728 }
 0x37d   : > { %v739_v53 = vsel %vm483_vm9, %v735_v10, %v729_v51  ;;  %v727_v54 = vpop.permute.xlu0 %726 }
 0x37e   : > { %v745_v55 = vrot.slane %v739_v53, 2  ;;  %v737_v56 = vsel %vm483_vm9, %v732_v52, %v727_v54 }
 0x37f   : > { %v744_v57 = vrot.slane %v737_v56, 2 }
 0x381   : > { %v746_v58 = vsel %vm515_vm6, %v744_v57, %v745_v55 }
 0x382   : > { %1146 = vmatmul.mubr.msk.bf16.vlgmr.msra.gmra.mrb[4].mxu0 %vm511_vm11, %v746_v58 }
 0x383   : > { %1157 = vmatprep.mubr.msk.bf16.mxu0 %vm1312_vm8, %v1310_v0  ;;  %v840_v0 = vsel %vm722_vm2, %v827_v1, 0  ;;  %1156 = vmatpush3.bf16.msra.mxu0 %v1213_v2 }
 0x384   : > { %1150 = vmatpush3.bf16.msra.mxu1 %v840_v0 }
 0x455   : > { %v792_v59 = vpop.f32.mrb[4].mxu0 }
 0x456   : > { %v801_v61 = vadd.f32 %v792_v59, %v696_v35  ;;  %v1147_v62 = vpop.f32.mrb[5].mxu0 }
 0x457   : > { %v795_v63 = vpop.f32.mrb[6].mxu0 }
 0x458   : > { %v810_v3 = vadd.f32 %v1108_v60, %v801_v61  ;;  %v802_v4 = vadd.f32 %v795_v63, %v697_v38  ;;  %v1148_v5 = vpop.f32.mrb[7].mxu0 }
 0x45a   : > { %812 = vst.msk [vmem:[#allocation2 + $0x8] sm:$0xff] %vm424_vm0, %v810_v3  ;;  %v811_v6 = vadd.f32 %v1108_v60, %v802_v4 }
 0x45c   : > { %813 = vst.msk [vmem:[#allocation2 + $0x10] sm:$0xff] %vm424_vm0, %v811_v6 }
 0x463   : > { %v886_v7 = vld [vmem:[#allocation2 + $0xa] ss:$4 sm:$0xf]  ;;  %v884_v8 = vld [vmem:[#allocation2 + $0x9] ss:$4 sm:$0xf] }
 0x464   : > { %894 = vrot.lane.b32.xlu1 %v886_v7, %s1311_s28  ;;  %890 = vrot.lane.b32.xlu0 %v884_v8, %s1313_s29  ;;  %v888_v11 = vld [vmem:[#allocation2 + $0xb] ss:$4 sm:$0xf]  ;;  %v883_v15 = vld [vmem:[#allocation2 + $0x8] ss:$4 sm:$0xf] }
 0x465   : > { %v817_v12 = vld [vmem:[#allocation2 + $0x9] ss:$2 sm:$0xff]  ;;  %v815_v20 = vld [vmem:[#allocation2 + $0x8] ss:$2 sm:$0xff]  ;;  %s1554_s28 = sand.u32 1, %s1300_s22  }
 0x466   : > { %s1097_s16 = sshll.u32 %s1554_s28, 2  ;;  %s970_s5 = scalar_lea.sflag [#allocation4], %s1554_s28 }
 0x467   : > { %s417_s2 = scalar_lea.vmem [#allocation5], %s1097_s16 }
 0x468   : > { %898 = vrot.lane.b32.xlu1 %v888_v11, %s1314_s15  ;;  %819 = vrot.lane.b32.xlu0 %v817_v12, %s1313_s29  ;;  %s1096_s29 = sshll.u32 %s1554_s28, 3  ;;  %s1001_s3 = sshll.u32 %s417_s2, 4  ;;  %s1578_s3 = int_to_ptr.vmem [resolvable:$true] %s1001_s3 }
 0x469   : > { %s410_s15 = scalar_lea.vmem [#allocation3], %s1096_s29 }
 0x46a   : > { %s988_s0 = sshll.u32 %s410_s15, 4  ;;  %s1571_s0 = int_to_ptr.vmem [resolvable:$true] %s988_s0 }
 0x46b   : > { %s1214_s16 = scalar_lea.vmem %s1571_s0, 128  ;;  %p1221_p0 = scmp.lt.s32.totalorder %s1571_s0, %s1219_s18 }
 0x46c   : > { %p1215_p11 = scmp.ne.s32.totalorder %s1571_s0, %s1214_s16  ;;  %p1222_p1 = scmp.lt.s32.totalorder %s1220_s19, %s1214_s16 }
 0x46e   : > { %p1216_p12 = pnand %p1215_p11, %p1420_p5  ;;  %p1223_p2 = por %p1222_p1, %p1221_p0 }
 0x470   : > { %p1217_p13 = pneg %p1216_p12 }
 0x472   : > { %p1224_p3 = pnand %p1223_p2, %p1217_p13 }
 0x4d6   : > { %v895_v13 = vpop.permute.xlu1 %894  ;;  %v891_v14 = vpop.permute.xlu0 %890 }
 0x4d7   : > { %v901_v16 = vsel %vm424_vm0, %v883_v15, %v891_v14 }
 0x4d8   : > { %v902_v18 = vsel %vm483_vm9, %v901_v16, %v895_v13 }
 0x4da   : > { %v899_v17 = vpop.permute.xlu1 %898  ;;  %v820_v19 = vpop.permute.xlu0 %819 }
 0x4db   : > { %v903_v21 = vsel %vm511_vm11, %v902_v18, %v899_v17  ;;  %v822_v22 = vsel %vm424_vm0, %v815_v20, %v820_v19  ;;  %vm967_vm0 = vcmask 125952  }
 0x4dc   : > { %vm904_vm3 = vcmp.ge.f32.partialorder %v903_v21, 0.0  ;;  %v905_v23 = vmul.f32 0.25, %v903_v21  ;;  %vm823_vm4 = vcmp.ge.f32.partialorder %v822_v22, 0.0  ;;  %v824_v24 = vmul.f32 0.25, %v822_v22 }
 0x4de   : > { %v906_v25 = vsel %vm904_vm3, %v903_v21, %v905_v23  ;;  %v825_v26 = vsel %vm823_vm4, %v822_v22, %v824_v24 }
 0x4df   : > { %v907_v27 = vpack.c.bf16 %v906_v25, %v906_v25  ;;  %v826_v28 = vpack.c.bf16 %v825_v26, %v825_v26 }
 0x4e1   : > { %1152 = vmatmul.mubr.msk.bf16.vlgmr.msra.gmra.mrb[4].mxu1 %vm483_vm9, %v826_v28  ;;  %1158 = vmatmul.mubr.msk.bf16.vlgmr.msra.gmra.mrb[8].mxu0 %vm923_vm5, %v907_v27 }
 0x5b4   : > { %v876_v31 = vpop.f32.mrb[4].mxu1  ;;  %v961_v32 = vpop.f32.mrb[8].mxu0 }
 0x5b5   : > { %v877_v33 = vadd.f32 %v1109_v29, %v876_v31  ;;  %v962_v34 = vadd.f32 %v1111_v30, %v961_v32  ;;  %v1153_v35 = vpop.f32.mrb[5].mxu1  ;;  %v1159_v36 = vpop.f32.mrb[9].mxu0 }
 0x5b6   : > { %v879_v37 = vpop.f32.mrb[6].mxu1  ;;  %v964_v38 = vpop.f32.mrb[10].mxu0 }
 0x5b7   : > { %v1154_v39 = vpop.f32.mrb[7].mxu1  ;;  %v1160_v40 = vpop.f32.mrb[11].mxu0  ;;  %882 = vst.msk [vmem:[%s410_s15] sm:$0xff] %vm483_vm9, %v877_v33 }
 0x5b8   : > { %968 = vst.msk [vmem:[%s417_s2] sm:$0xf] %vm967_vm0, %v962_v34 }
 0x5b9   : > { %1227 = shalt.err (!%p1224_p3)
}
 0x5ba   : > { %s1228_s1 = scalar_lea.hbm %s1569_s6, 128  ;;  %s1232_s26 = scalar_lea.hbm %s1653_s11, 256 }
 0x5bb   : > { %p1229_p4 = scmp.ne.s32.totalorder %s1569_s6, %s1228_s1  ;;  %p1233_p9 = scmp.lt.u32.totalorder %s1569_s6, %s1653_s11 }
 0x5bc   : > { %p1234_p10 = scmp.lt.u32.totalorder %s1232_s26, %s1228_s1  ;;  %p1236_p12 = scmp.lt.u32.totalorder %s1228_s1, %s1569_s6 }
 0x5bd   : > { %p1230_p7 = pnand %p1229_p4, %p1420_p5 }
 0x5be   : > { %p1235_p11 = por %p1234_p10, %p1233_p9 }
 0x5bf   : > { %p1231_p8 = pneg %p1230_p7 }
 0x5c0   : > { %p1237_p13 = por %p1236_p12, %p1235_p11 }
 0x5c2   : > { %p1238_p0 = pnand %p1237_p13, %p1231_p8 }
 0x5c4   : > { %1241 = shalt.err (!%p1238_p0)
}
 0x5c5   : > { %1161 = dma.vmem_to_hbm [thread:$0]  (%p1420_p5), %s1571_s0, 128, %s1569_s6, %s970_s5  }
 0x5c6   : > { %s975_s29 = scalar_lea.sflag [#allocation6], %s1554_s28  ;;  %s1242_s16 = scalar_lea.vmem %s1578_s3, 64 }
 0x5c7   : > { %p1243_p1 = scmp.ne.s32.totalorder %s1578_s3, %s1242_s16  ;;  %s1316_s17 = smov [#allocation5]  }
 0x5c8   : > { %s1246_s18 = sshll.u32 %s1316_s17, 4  ;;  %s1247_s18 = int_to_ptr.vmem [resolvable:$false] %s1246_s18 }
 0x5c9   : > { %p1244_p2 = pnand %p1243_p1, %p1420_p5  ;;  %s1248_s19 = scalar_lea.vmem %s1247_s18, 128 }
 0x5ca   : > { %p1249_p4 = scmp.lt.s32.totalorder %s1578_s3, %s1247_s18  ;;  %p1250_p7 = scmp.lt.s32.totalorder %s1248_s19, %s1242_s16 }
 0x5cb   : > { %p1245_p3 = pneg %p1244_p2 }
 0x5cc   : > { %p1251_p8 = por %p1250_p7, %p1249_p4 }
 0x5ce   : > { %p1252_p9 = pnand %p1251_p8, %p1245_p3 }
 0x5d0   : > { %1255 = shalt.err (!%p1252_p9)
}
 0x5d1   : > { %s1256_s0 = scalar_lea.hbm %s1576_s4, 64  ;;  %s1260_s5 = scalar_lea.hbm %s1654_s12, 128 }
 0x5d2   : > { %p1257_p10 = scmp.ne.s32.totalorder %s1576_s4, %s1256_s0  ;;  %p1261_p13 = scmp.lt.u32.totalorder %s1576_s4, %s1654_s12 }
 0x5d3   : > { %p1262_p0 = scmp.lt.u32.totalorder %s1260_s5, %s1256_s0  ;;  %p1264_p2 = scmp.lt.u32.totalorder %s1256_s0, %s1576_s4 }
 0x5d4   : > { %p1258_p11 = pnand %p1257_p10, %p1420_p5 }
 0x5d5   : > { %p1263_p1 = por %p1262_p0, %p1261_p13 }
 0x5d6   : > { %p1259_p12 = pneg %p1258_p11 }
 0x5d7   : > { %p1265_p3 = por %p1264_p2, %p1263_p1 }
 0x5d9   : > { %p1266_p4 = pnand %p1265_p3, %p1259_p12 }
 0x5db   : > { %1269 = shalt.err (!%p1266_p4)
}
 0x5dc   : > { %1162 = dma.vmem_to_hbm [thread:$0]  (%p1420_p5), %s1578_s3, 64, %s1576_s4, %s975_s29  }
 0x5dd PF: > { %p1172_p7 = scmp.ge.s32.totalorder %s1308_s24, 2  ;;  %s1013_s20 = sand.u32 1, %s1296_s21  }
 0x5de   : > { %s1014_s26 = scalar_lea.sflag [#allocation4], %s1013_s20 }
 0x5df   : > { %p1166_p8 = pnand %p1172_p7, %p1424_p6 }
 0x5e1   : > { %1287 = dma.done.wait (!%p1166_p8), %s1014_s26, 128  }
 0x5e2   : > { %1289 = vsyncadd (!%p1166_p8), %s1014_s26, 4294967168  ;;  %s1023_s15 = scalar_lea.sflag [#allocation6], %s1013_s20 }
 0x5e3   : > { %1291 = dma.done.wait (!%p1166_p8), %s1023_s15, 64  }
 0x5e4   : > { %1293 = vsyncadd (!%p1166_p8), %s1023_s15, 4294967232  ;;  %p26_p5 = scmp.ge.s32.totalorder %s1407_s27, 4   ;;  %s1671_s21 = smov %s1300_s22 }
 0x5e5   : > { %s1672_s22 = smov %s1304_s23  ;;  %s1673_s23 = smov %s1418_s30 }
 0x5e6   : > { %s1674_s24 = smov %s1407_s27  ;;  %28 = sbr.rel (!%p26_p5) target bundleno = 13 (0xd), region = 120 }
 0x5ed   :  { %1028 = vsyncpa [#allocation4], 1 }
 0x5ee   :  { %1030 = vsyncpa [#allocation4 + $0x1], 1 }
 0x5ef   :  { %1031 = vsyncpa [#allocation6], 1 }
 0x5f0   :  { %1033 = vsyncpa [#allocation6 + $0x1], 1 }

</bundles_post_ra>
